<compile_context>
chip_gen: v7x
topology: tpu7x:2x2x1
jax: 0.10.0
libtpu: 0.0.40
codegen_flags: <defaults>
</compile_context>

<pallas_src>
import functools

import jax
import jax.numpy as jnp
from jax import lax
from jax.experimental import pallas as pl
from jax.experimental.pallas import tpu as pltpu


def _semiresidual_kernel(x_ref, y_ref, w_ref, b_ref, m_ref,
                         o1_ref, o2_ref,
                         xpad_ref, ypad_ref, sx_ref, sy_ref,
                         *, H, W, C, PAD):
    """One batch element: o1 = f(x), o2 = g(y) + h(x).

    x_ref, y_ref : (1, C, HW)        inputs, flattened spatial on lanes.
    w_ref        : (3, C, 9C)        tap-stacked weights [Wf ; Wh ; Wg].
    b_ref        : (2, C, 1)         bias columns [bf ; bg + bh].
    m_ref        : (2, HW)           horizontal-wrap validity masks
                                     (row 0: reading w-1 valid, row 1: w+1 valid).
    o1_ref       : (1, C, HW)        f(x).
    o2_ref       : (1, C, HW)        g(y) + h(x).
    xpad_ref/ypad_ref : (C, HW+2*PAD) zero-padded tiles (VMEM scratch).
    sx_ref/sy_ref     : (9C, HW)      im2col-over-taps scratches (VMEM).
    """
    HW = H * W

    # --- Assemble the padded tiles in VMEM (no wrapper-side jnp.pad). -------
    # PAD is a multiple of 128 so the zero fills and the data copy land on
    # lane-aligned offsets.
    zeros_pad = jnp.zeros((C, PAD), dtype=xpad_ref.dtype)
    xpad_ref[:, 0:PAD] = zeros_pad
    xpad_ref[:, PAD + HW:PAD + HW + PAD] = zeros_pad
    xpad_ref[:, PAD:PAD + HW] = x_ref[0]
    ypad_ref[:, 0:PAD] = zeros_pad
    ypad_ref[:, PAD + HW:PAD + HW + PAD] = zeros_pad
    ypad_ref[:, PAD:PAD + HW] = y_ref[0]

    mask_l = m_ref[0:1, :]   # (1, HW): 0 where output col w == 0    (tap reads w-1)
    mask_r = m_ref[1:2, :]   # (1, HW): 0 where output col w == W-1  (tap reads w+1)

    # --- im2col over the 9 taps (wrap masks fused into the copies). --------
    for kh in range(3):
        for kw in range(3):
            t = kh * 3 + kw
            dh, dw = kh - 1, kw - 1
            off = PAD + dh * W + dw             # static lane offset
            xw = xpad_ref[:, off:off + HW]      # (C, HW) shifted window
            yw = ypad_ref[:, off:off + HW]
            if dw == -1:
                xw = xw * mask_l
                yw = yw * mask_l
            elif dw == 1:
                xw = xw * mask_r
                yw = yw * mask_r
            sx_ref[t * C:(t + 1) * C, :] = xw
            sy_ref[t * C:(t + 1) * C, :] = yw

    # --- Three deep MXU matmuls (K = 9C), f32 accumulation. ----------------
    sx = sx_ref[...]
    sy = sy_ref[...]
    o1 = jnp.dot(w_ref[0], sx, preferred_element_type=jnp.float32)       # f(x)
    o2 = (jnp.dot(w_ref[1], sx, preferred_element_type=jnp.float32)      # h(x)
          + jnp.dot(w_ref[2], sy, preferred_element_type=jnp.float32))   # + g(y)

    o1_ref[0] = (o1 + b_ref[0]).astype(o1_ref.dtype)
    o2_ref[0] = (o2 + b_ref[1]).astype(o2_ref.dtype)


def semi_residual_block(x_nchw, y_nchw, params):
    """forward(x, y) -> (f(x), g(y) + h(x)), f/g/h = 3x3 same-pad conv + bias.

    x_nchw, y_nchw: (N, C, H, W) float32
    params: dict with wf, wg, wh (3,3,C,C HWIO) and bf, bg, bh (1,C)
    returns: (out1, out2) each (N, C, H, W)
    """
    N, C, H, W = x_nchw.shape
    HW = H * W
    PAD = ((W + 1 + 127) // 128) * 128      # lane-aligned pad >= W+1 per side
    HWp = HW + 2 * PAD

    # Free reshapes only: channels on sublanes, flattened spatial on lanes.
    x2 = x_nchw.reshape(N, C, HW)
    y2 = y_nchw.reshape(N, C, HW)

    # Tap-stacked weights (tiny): out[co] = sum_{t,ci} W[co, t*C+ci] * win_t[ci].
    def stack_taps(w):                   # (3, 3, Cin, Cout) -> (Cout, 9*Cin)
        return jnp.transpose(w.reshape(9, C, C), (2, 0, 1)).reshape(C, 9 * C)

    w_all = jnp.stack([stack_taps(params["wf"]),
                       stack_taps(params["wh"]),
                       stack_taps(params["wg"])], axis=0)            # (3, C, 9C)
    b_all = jnp.stack([params["bf"][0],
                       params["bg"][0] + params["bh"][0]],
                      axis=0).reshape(2, C, 1)                       # (2, C, 1)

    # Horizontal-wrap validity masks over output lanes (tiny, precomputed).
    col = jnp.arange(HW, dtype=jnp.int32) % W
    masks = jnp.stack([(col != 0), (col != W - 1)]).astype(x_nchw.dtype)  # (2, HW)

    kern = functools.partial(_semiresidual_kernel, H=H, W=W, C=C, PAD=PAD)

    # TODO(synk): for realistic cresnet sizes (C >= 64, H*W >= 64*64) add
    # H-tiling with a 1-row halo (grid=(N, H//tile_h), tile-local masks and
    # offsets, HW-tile a multiple of 128) and bf16 storage with f32 MXU
    # accumulation on v6e/v7x; for tiny C (< 32) fold the batch into the lane
    # axis so one grid step processes all N images.

    out1, out2 = pl.pallas_call(
        kern,
        out_shape=(jax.ShapeDtypeStruct((N, C, HW), x_nchw.dtype),
                   jax.ShapeDtypeStruct((N, C, HW), x_nchw.dtype)),
        grid_spec=pltpu.PrefetchScalarGridSpec(
            num_scalar_prefetch=0,
            grid=(N,),
            in_specs=[
                pl.BlockSpec((1, C, HW), lambda n: (n, 0, 0)),        # x
                pl.BlockSpec((1, C, HW), lambda n: (n, 0, 0)),        # y
                pl.BlockSpec((3, C, 9 * C), lambda n: (0, 0, 0)),     # weights
                pl.BlockSpec((2, C, 1), lambda n: (0, 0, 0)),         # biases
                pl.BlockSpec((2, HW), lambda n: (0, 0)),              # masks
            ],
            out_specs=[
                pl.BlockSpec((1, C, HW), lambda n: (n, 0, 0)),        # f(x)
                pl.BlockSpec((1, C, HW), lambda n: (n, 0, 0)),        # g(y)+h(x)
            ],
            scratch_shapes=[
                pltpu.VMEM((C, HWp), x_nchw.dtype),       # padded x tile
                pltpu.VMEM((C, HWp), x_nchw.dtype),       # padded y tile
                pltpu.VMEM((9 * C, HW), x_nchw.dtype),    # im2col(x)
                pltpu.VMEM((9 * C, HW), x_nchw.dtype),    # im2col(y)
            ],
        ),
        compiler_params=pltpu.CompilerParams(
            dimension_semantics=("parallel",)),
    )(x2, y2, w_all, b_all, masks)

    # Only free reshapes in the wrapper: no concat, no pad, no channel slices.
    return out1.reshape(N, C, H, W), out2.reshape(N, C, H, W)


# ----------------------------- reference ----------------------------------- #

def _conv_ref_nchw(x, w, b):
    out = lax.conv_general_dilated(
        x, w, window_strides=(1, 1), padding="SAME",
        dimension_numbers=("NCHW", "HWIO", "NCHW"))
    return out + b[0][None, :, None, None]


def _reference(x_nchw, y_nchw, params):
    f_x = _conv_ref_nchw(x_nchw, params["wf"], params["bf"])
    g_y = _conv_ref_nchw(y_nchw, params["wg"], params["bg"])
    h_x = _conv_ref_nchw(x_nchw, params["wh"], params["bh"])
    return f_x, g_y + h_x


if __name__ == "__main__":
    N, C, H, W = 2, 4, 16, 16

    key = jax.random.PRNGKey(0)
    kx, ky, kwf, kwg, kwh, kbf, kbg, kbh = jax.random.split(key, 8)

    x = jax.random.normal(kx, (N, C, H, W), dtype=jnp.float32)
    y = jax.random.normal(ky, (N, C, H, W), dtype=jnp.float32)

    scale = 1.0 / jnp.sqrt(9.0 * C)  # kaiming-ish deterministic init
    params = {
        "wf": jax.random.normal(kwf, (3, 3, C, C), dtype=jnp.float32) * scale,
        "wg": jax.random.normal(kwg, (3, 3, C, C), dtype=jnp.float32) * scale,
        "wh": jax.random.normal(kwh, (3, 3, C, C), dtype=jnp.float32) * scale,
        "bf": jax.random.normal(kbf, (1, C), dtype=jnp.float32) * 0.1,
        "bg": jax.random.normal(kbg, (1, C), dtype=jnp.float32) * 0.1,
        "bh": jax.random.normal(kbh, (1, C), dtype=jnp.float32) * 0.1,
    }

    out1, out2 = jax.block_until_ready(semi_residual_block(x, y, params))
    ref1, ref2 = jax.block_until_ready(_reference(x, y, params))

    assert out1.shape == (N, C, H, W) and out2.shape == (N, C, H, W)
    assert jnp.allclose(out1, ref1, atol=1e-4, rtol=1e-4)
    assert jnp.allclose(out2, ref2, atol=1e-4, rtol=1e-4)

    print("KERNEL_OK")
</pallas_src>

<mosaic_0001>
module attributes {stable_mosaic.version = 11 : i64} {
  func.func @_semiresidual_kernel(%arg0: i32, %arg1: memref<1x4x256xf32, #tpu.memory_space<vmem>>, %arg2: memref<1x4x256xf32, #tpu.memory_space<vmem>>, %arg3: memref<3x4x36xf32, #tpu.memory_space<vmem>>, %arg4: memref<2x4x1xf32, #tpu.memory_space<vmem>>, %arg5: memref<2x256xf32, #tpu.memory_space<vmem>>, %arg6: memref<1x4x256xf32, #tpu.memory_space<vmem>>, %arg7: memref<1x4x256xf32, #tpu.memory_space<vmem>>, %arg8: memref<4x512xf32, #tpu.memory_space<vmem>>, %arg9: memref<4x512xf32, #tpu.memory_space<vmem>>, %arg10: memref<36x256xf32, #tpu.memory_space<vmem>>, %arg11: memref<36x256xf32, #tpu.memory_space<vmem>>) attributes {dimension_semantics = [#tpu.dimension_semantics<parallel>], iteration_bounds = array<i64: 2>, scalar_prefetch = 0 : i64, scratch_operands = 4 : i64, tpu.core_type = #tpu.core_type<tc>, window_params = [{transform_indices = @transform_0, window_bounds = array<i64: 1, 4, 256>}, {transform_indices = @transform_1, window_bounds = array<i64: 1, 4, 256>}, {pipeline_mode = #tpu.pipeline_mode<synchronous>, transform_indices = @transform_2, window_bounds = array<i64: 3, 4, 36>}, {pipeline_mode = #tpu.pipeline_mode<synchronous>, transform_indices = @transform_3, window_bounds = array<i64: 2, 4, 1>}, {pipeline_mode = #tpu.pipeline_mode<synchronous>, transform_indices = @transform_4, window_bounds = array<i64: 2, 256>}, {transform_indices = @transform_5, window_bounds = array<i64: 1, 4, 256>}, {transform_indices = @transform_6, window_bounds = array<i64: 1, 4, 256>}]} {
    %cst = arith.constant 0.000000e+00 : f32
    %0 = vector.broadcast %cst : f32 to vector<4x128xf32>
    %c0 = arith.constant 0 : index
    %c0_0 = arith.constant 0 : index
    %1 = vector.load %arg8[%c0, %c0_0] : memref<4x512xf32, #tpu.memory_space<vmem>>, vector<4x128xf32>
    tpu.vector_store %arg8[%c0, %c0_0], %0 {strides = array<i32>} : memref<4x512xf32, #tpu.memory_space<vmem>>, vector<4x128xf32>,
    %c0_1 = arith.constant 0 : index
    %c384 = arith.constant 384 : index
    %2 = vector.load %arg8[%c0_1, %c384] : memref<4x512xf32, #tpu.memory_space<vmem>>, vector<4x128xf32>
    tpu.vector_store %arg8[%c0_1, %c384], %0 {strides = array<i32>} : memref<4x512xf32, #tpu.memory_space<vmem>>, vector<4x128xf32>,
    %c0_2 = arith.constant 0 : index
    %c0_3 = arith.constant 0 : index
    %c0_4 = arith.constant 0 : index
    %3 = vector.load %arg1[%c0_2, %c0_3, %c0_4] : memref<1x4x256xf32, #tpu.memory_space<vmem>>, vector<1x4x256xf32>
    %4 = vector.shape_cast %3 : vector<1x4x256xf32> to vector<4x256xf32>
    %c0_5 = arith.constant 0 : index
    %c128 = arith.constant 128 : index
    %5 = vector.load %arg8[%c0_5, %c128] : memref<4x512xf32, #tpu.memory_space<vmem>>, vector<4x256xf32>
    tpu.vector_store %arg8[%c0_5, %c128], %4 {strides = array<i32>} : memref<4x512xf32, #tpu.memory_space<vmem>>, vector<4x256xf32>,
    %c0_6 = arith.constant 0 : index
    %c0_7 = arith.constant 0 : index
    %6 = vector.load %arg9[%c0_6, %c0_7] : memref<4x512xf32, #tpu.memory_space<vmem>>, vector<4x128xf32>
    tpu.vector_store %arg9[%c0_6, %c0_7], %0 {strides = array<i32>} : memref<4x512xf32, #tpu.memory_space<vmem>>, vector<4x128xf32>,
    %c0_8 = arith.constant 0 : index
    %c384_9 = arith.constant 384 : index
    %7 = vector.load %arg9[%c0_8, %c384_9] : memref<4x512xf32, #tpu.memory_space<vmem>>, vector<4x128xf32>
    tpu.vector_store %arg9[%c0_8, %c384_9], %0 {strides = array<i32>} : memref<4x512xf32, #tpu.memory_space<vmem>>, vector<4x128xf32>,
    %c0_10 = arith.constant 0 : index
    %c0_11 = arith.constant 0 : index
    %c0_12 = arith.constant 0 : index
    %8 = vector.load %arg2[%c0_10, %c0_11, %c0_12] : memref<1x4x256xf32, #tpu.memory_space<vmem>>, vector<1x4x256xf32>
    %9 = vector.shape_cast %8 : vector<1x4x256xf32> to vector<4x256xf32>
    %c0_13 = arith.constant 0 : index
    %c128_14 = arith.constant 128 : index
    %10 = vector.load %arg9[%c0_13, %c128_14] : memref<4x512xf32, #tpu.memory_space<vmem>>, vector<4x256xf32>
    tpu.vector_store %arg9[%c0_13, %c128_14], %9 {strides = array<i32>} : memref<4x512xf32, #tpu.memory_space<vmem>>, vector<4x256xf32>,
    %c0_15 = arith.constant 0 : index
    %c0_16 = arith.constant 0 : index
    %11 = vector.load %arg5[%c0_15, %c0_16] : memref<2x256xf32, #tpu.memory_space<vmem>>, vector<1x256xf32>
    %c1 = arith.constant 1 : index
    %c0_17 = arith.constant 0 : index
    %12 = vector.load %arg5[%c1, %c0_17] : memref<2x256xf32, #tpu.memory_space<vmem>>, vector<1x256xf32>
    %c0_18 = arith.constant 0 : index
    %c111 = arith.constant 111 : index
    %13 = vector.load %arg8[%c0_18, %c111] : memref<4x512xf32, #tpu.memory_space<vmem>>, vector<4x256xf32>
    %c0_19 = arith.constant 0 : index
    %c111_20 = arith.constant 111 : index
    %14 = vector.load %arg9[%c0_19, %c111_20] : memref<4x512xf32, #tpu.memory_space<vmem>>, vector<4x256xf32>
    %15 = vector.broadcast %11 : vector<1x256xf32> to vector<4x256xf32>
    %16 = arith.mulf %13, %15 : vector<4x256xf32>
    %17 = vector.broadcast %11 : vector<1x256xf32> to vector<4x256xf32>
    %18 = arith.mulf %14, %17 : vector<4x256xf32>
    %c0_21 = arith.constant 0 : index
    %c0_22 = arith.constant 0 : index
    %19 = vector.load %arg10[%c0_21, %c0_22] : memref<36x256xf32, #tpu.memory_space<vmem>>, vector<4x256xf32>
    tpu.vector_store %arg10[%c0_21, %c0_22], %16 {strides = array<i32>} : memref<36x256xf32, #tpu.memory_space<vmem>>, vector<4x256xf32>,
    %c0_23 = arith.constant 0 : index
    %c0_24 = arith.constant 0 : index
    %20 = vector.load %arg11[%c0_23, %c0_24] : memref<36x256xf32, #tpu.memory_space<vmem>>, vector<4x256xf32>
    tpu.vector_store %arg11[%c0_23, %c0_24], %18 {strides = array<i32>} : memref<36x256xf32, #tpu.memory_space<vmem>>, vector<4x256xf32>,
    %c0_25 = arith.constant 0 : index
    %c112 = arith.constant 112 : index
    %21 = vector.load %arg8[%c0_25, %c112] : memref<4x512xf32, #tpu.memory_space<vmem>>, vector<4x256xf32>
    %c0_26 = arith.constant 0 : index
    %c112_27 = arith.constant 112 : index
    %22 = vector.load %arg9[%c0_26, %c112_27] : memref<4x512xf32, #tpu.memory_space<vmem>>, vector<4x256xf32>
    %c4 = arith.constant 4 : index
    %c0_28 = arith.constant 0 : index
    %23 = vector.load %arg10[%c4, %c0_28] : memref<36x256xf32, #tpu.memory_space<vmem>>, vector<4x256xf32>
    tpu.vector_store %arg10[%c4, %c0_28], %21 {strides = array<i32>} : memref<36x256xf32, #tpu.memory_space<vmem>>, vector<4x256xf32>,
    %c4_29 = arith.constant 4 : index
    %c0_30 = arith.constant 0 : index
    %24 = vector.load %arg11[%c4_29, %c0_30] : memref<36x256xf32, #tpu.memory_space<vmem>>, vector<4x256xf32>
    tpu.vector_store %arg11[%c4_29, %c0_30], %22 {strides = array<i32>} : memref<36x256xf32, #tpu.memory_space<vmem>>, vector<4x256xf32>,
    %c0_31 = arith.constant 0 : index
    %c113 = arith.constant 113 : index
    %25 = vector.load %arg8[%c0_31, %c113] : memref<4x512xf32, #tpu.memory_space<vmem>>, vector<4x256xf32>
    %c0_32 = arith.constant 0 : index
    %c113_33 = arith.constant 113 : index
    %26 = vector.load %arg9[%c0_32, %c113_33] : memref<4x512xf32, #tpu.memory_space<vmem>>, vector<4x256xf32>
    %27 = vector.broadcast %12 : vector<1x256xf32> to vector<4x256xf32>
    %28 = arith.mulf %25, %27 : vector<4x256xf32>
    %29 = vector.broadcast %12 : vector<1x256xf32> to vector<4x256xf32>
    %30 = arith.mulf %26, %29 : vector<4x256xf32>
    %c8 = arith.constant 8 : index
    %c0_34 = arith.constant 0 : index
    %31 = vector.load %arg10[%c8, %c0_34] : memref<36x256xf32, #tpu.memory_space<vmem>>, vector<4x256xf32>
    tpu.vector_store %arg10[%c8, %c0_34], %28 {strides = array<i32>} : memref<36x256xf32, #tpu.memory_space<vmem>>, vector<4x256xf32>,
    %c8_35 = arith.constant 8 : index
    %c0_36 = arith.constant 0 : index
    %32 = vector.load %arg11[%c8_35, %c0_36] : memref<36x256xf32, #tpu.memory_space<vmem>>, vector<4x256xf32>
    tpu.vector_store %arg11[%c8_35, %c0_36], %30 {strides = array<i32>} : memref<36x256xf32, #tpu.memory_space<vmem>>, vector<4x256xf32>,
    %c0_37 = arith.constant 0 : index
    %c127 = arith.constant 127 : index
    %33 = vector.load %arg8[%c0_37, %c127] : memref<4x512xf32, #tpu.memory_space<vmem>>, vector<4x256xf32>
    %c0_38 = arith.constant 0 : index
    %c127_39 = arith.constant 127 : index
    %34 = vector.load %arg9[%c0_38, %c127_39] : memref<4x512xf32, #tpu.memory_space<vmem>>, vector<4x256xf32>
    %35 = vector.broadcast %11 : vector<1x256xf32> to vector<4x256xf32>
    %36 = arith.mulf %33, %35 : vector<4x256xf32>
    %37 = vector.broadcast %11 : vector<1x256xf32> to vector<4x256xf32>
    %38 = arith.mulf %34, %37 : vector<4x256xf32>
    %c12 = arith.constant 12 : index
    %c0_40 = arith.constant 0 : index
    %39 = vector.load %arg10[%c12, %c0_40] : memref<36x256xf32, #tpu.memory_space<vmem>>, vector<4x256xf32>
    tpu.vector_store %arg10[%c12, %c0_40], %36 {strides = array<i32>} : memref<36x256xf32, #tpu.memory_space<vmem>>, vector<4x256xf32>,
    %c12_41 = arith.constant 12 : index
    %c0_42 = arith.constant 0 : index
    %40 = vector.load %arg11[%c12_41, %c0_42] : memref<36x256xf32, #tpu.memory_space<vmem>>, vector<4x256xf32>
    tpu.vector_store %arg11[%c12_41, %c0_42], %38 {strides = array<i32>} : memref<36x256xf32, #tpu.memory_space<vmem>>, vector<4x256xf32>,
    %c0_43 = arith.constant 0 : index
    %c128_44 = arith.constant 128 : index
    %41 = vector.load %arg8[%c0_43, %c128_44] : memref<4x512xf32, #tpu.memory_space<vmem>>, vector<4x256xf32>
    %c0_45 = arith.constant 0 : index
    %c128_46 = arith.constant 128 : index
    %42 = vector.load %arg9[%c0_45, %c128_46] : memref<4x512xf32, #tpu.memory_space<vmem>>, vector<4x256xf32>
    %c16 = arith.constant 16 : index
    %c0_47 = arith.constant 0 : index
    %43 = vector.load %arg10[%c16, %c0_47] : memref<36x256xf32, #tpu.memory_space<vmem>>, vector<4x256xf32>
    tpu.vector_store %arg10[%c16, %c0_47], %41 {strides = array<i32>} : memref<36x256xf32, #tpu.memory_space<vmem>>, vector<4x256xf32>,
    %c16_48 = arith.constant 16 : index
    %c0_49 = arith.constant 0 : index
    %44 = vector.load %arg11[%c16_48, %c0_49] : memref<36x256xf32, #tpu.memory_space<vmem>>, vector<4x256xf32>
    tpu.vector_store %arg11[%c16_48, %c0_49], %42 {strides = array<i32>} : memref<36x256xf32, #tpu.memory_space<vmem>>, vector<4x256xf32>,
    %c0_50 = arith.constant 0 : index
    %c129 = arith.constant 129 : index
    %45 = vector.load %arg8[%c0_50, %c129] : memref<4x512xf32, #tpu.memory_space<vmem>>, vector<4x256xf32>
    %c0_51 = arith.constant 0 : index
    %c129_52 = arith.constant 129 : index
    %46 = vector.load %arg9[%c0_51, %c129_52] : memref<4x512xf32, #tpu.memory_space<vmem>>, vector<4x256xf32>
    %47 = vector.broadcast %12 : vector<1x256xf32> to vector<4x256xf32>
    %48 = arith.mulf %45, %47 : vector<4x256xf32>
    %49 = vector.broadcast %12 : vector<1x256xf32> to vector<4x256xf32>
    %50 = arith.mulf %46, %49 : vector<4x256xf32>
    %c20 = arith.constant 20 : index
    %c0_53 = arith.constant 0 : index
    %51 = vector.load %arg10[%c20, %c0_53] : memref<36x256xf32, #tpu.memory_space<vmem>>, vector<4x256xf32>
    tpu.vector_store %arg10[%c20, %c0_53], %48 {strides = array<i32>} : memref<36x256xf32, #tpu.memory_space<vmem>>, vector<4x256xf32>,
    %c20_54 = arith.constant 20 : index
    %c0_55 = arith.constant 0 : index
    %52 = vector.load %arg11[%c20_54, %c0_55] : memref<36x256xf32, #tpu.memory_space<vmem>>, vector<4x256xf32>
    tpu.vector_store %arg11[%c20_54, %c0_55], %50 {strides = array<i32>} : memref<36x256xf32, #tpu.memory_space<vmem>>, vector<4x256xf32>,
    %c0_56 = arith.constant 0 : index
    %c143 = arith.constant 143 : index
    %53 = vector.load %arg8[%c0_56, %c143] : memref<4x512xf32, #tpu.memory_space<vmem>>, vector<4x256xf32>
    %c0_57 = arith.constant 0 : index
    %c143_58 = arith.constant 143 : index
    %54 = vector.load %arg9[%c0_57, %c143_58] : memref<4x512xf32, #tpu.memory_space<vmem>>, vector<4x256xf32>
    %55 = vector.broadcast %11 : vector<1x256xf32> to vector<4x256xf32>
    %56 = arith.mulf %53, %55 : vector<4x256xf32>
    %57 = vector.broadcast %11 : vector<1x256xf32> to vector<4x256xf32>
    %58 = arith.mulf %54, %57 : vector<4x256xf32>
    %c24 = arith.constant 24 : index
    %c0_59 = arith.constant 0 : index
    %59 = vector.load %arg10[%c24, %c0_59] : memref<36x256xf32, #tpu.memory_space<vmem>>, vector<4x256xf32>
    tpu.vector_store %arg10[%c24, %c0_59], %56 {strides = array<i32>} : memref<36x256xf32, #tpu.memory_space<vmem>>, vector<4x256xf32>,
    %c24_60 = arith.constant 24 : index
    %c0_61 = arith.constant 0 : index
    %60 = vector.load %arg11[%c24_60, %c0_61] : memref<36x256xf32, #tpu.memory_space<vmem>>, vector<4x256xf32>
    tpu.vector_store %arg11[%c24_60, %c0_61], %58 {strides = array<i32>} : memref<36x256xf32, #tpu.memory_space<vmem>>, vector<4x256xf32>,
    %c0_62 = arith.constant 0 : index
    %c144 = arith.constant 144 : index
    %61 = vector.load %arg8[%c0_62, %c144] : memref<4x512xf32, #tpu.memory_space<vmem>>, vector<4x256xf32>
    %c0_63 = arith.constant 0 : index
    %c144_64 = arith.constant 144 : index
    %62 = vector.load %arg9[%c0_63, %c144_64] : memref<4x512xf32, #tpu.memory_space<vmem>>, vector<4x256xf32>
    %c28 = arith.constant 28 : index
    %c0_65 = arith.constant 0 : index
    %63 = vector.load %arg10[%c28, %c0_65] : memref<36x256xf32, #tpu.memory_space<vmem>>, vector<4x256xf32>
    tpu.vector_store %arg10[%c28, %c0_65], %61 {strides = array<i32>} : memref<36x256xf32, #tpu.memory_space<vmem>>, vector<4x256xf32>,
    %c28_66 = arith.constant 28 : index
    %c0_67 = arith.constant 0 : index
    %64 = vector.load %arg11[%c28_66, %c0_67] : memref<36x256xf32, #tpu.memory_space<vmem>>, vector<4x256xf32>
    tpu.vector_store %arg11[%c28_66, %c0_67], %62 {strides = array<i32>} : memref<36x256xf32, #tpu.memory_space<vmem>>, vector<4x256xf32>,
    %c0_68 = arith.constant 0 : index
    %c145 = arith.constant 145 : index
    %65 = vector.load %arg8[%c0_68, %c145] : memref<4x512xf32, #tpu.memory_space<vmem>>, vector<4x256xf32>
    %c0_69 = arith.constant 0 : index
    %c145_70 = arith.constant 145 : index
    %66 = vector.load %arg9[%c0_69, %c145_70] : memref<4x512xf32, #tpu.memory_space<vmem>>, vector<4x256xf32>
    %67 = vector.broadcast %12 : vector<1x256xf32> to vector<4x256xf32>
    %68 = arith.mulf %65, %67 : vector<4x256xf32>
    %69 = vector.broadcast %12 : vector<1x256xf32> to vector<4x256xf32>
    %70 = arith.mulf %66, %69 : vector<4x256xf32>
    %c32 = arith.constant 32 : index
    %c0_71 = arith.constant 0 : index
    %71 = vector.load %arg10[%c32, %c0_71] : memref<36x256xf32, #tpu.memory_space<vmem>>, vector<4x256xf32>
    tpu.vector_store %arg10[%c32, %c0_71], %68 {strides = array<i32>} : memref<36x256xf32, #tpu.memory_space<vmem>>, vector<4x256xf32>,
    %c32_72 = arith.constant 32 : index
    %c0_73 = arith.constant 0 : index
    %72 = vector.load %arg11[%c32_72, %c0_73] : memref<36x256xf32, #tpu.memory_space<vmem>>, vector<4x256xf32>
    tpu.vector_store %arg11[%c32_72, %c0_73], %70 {strides = array<i32>} : memref<36x256xf32, #tpu.memory_space<vmem>>, vector<4x256xf32>,
    %c0_74 = arith.constant 0 : index
    %c0_75 = arith.constant 0 : index
    %73 = vector.load %arg10[%c0_74, %c0_75] : memref<36x256xf32, #tpu.memory_space<vmem>>, vector<36x256xf32>
    %c0_76 = arith.constant 0 : index
    %c0_77 = arith.constant 0 : index
    %74 = vector.load %arg11[%c0_76, %c0_77] : memref<36x256xf32, #tpu.memory_space<vmem>>, vector<36x256xf32>
    %c0_78 = arith.constant 0 : index
    %c0_79 = arith.constant 0 : index
    %c0_80 = arith.constant 0 : index
    %75 = vector.load %arg3[%c0_78, %c0_79, %c0_80] : memref<3x4x36xf32, #tpu.memory_space<vmem>>, vector<1x4x36xf32>
    %76 = vector.shape_cast %75 : vector<1x4x36xf32> to vector<4x36xf32>
    %cst_81 = arith.constant dense<0.000000e+00> : vector<4x256xf32>
    %77 = tpu.matmul %76, %73, %cst_81 {dimension_numbers = #tpu.dot_dimension_numbers<[1], [0], [0], [1], [0, 0, 1, 1], [], []>} : vector<4x36xf32>, vector<36x256xf32>, vector<4x256xf32> -> vector<4x256xf32>
    %c1_82 = arith.constant 1 : index
    %c0_83 = arith.constant 0 : index
    %c0_84 = arith.constant 0 : index
    %78 = vector.load %arg3[%c1_82, %c0_83, %c0_84] : memref<3x4x36xf32, #tpu.memory_space<vmem>>, vector<1x4x36xf32>
    %79 = vector.shape_cast %78 : vector<1x4x36xf32> to vector<4x36xf32>
    %cst_85 = arith.constant dense<0.000000e+00> : vector<4x256xf32>
    %80 = tpu.matmul %79, %73, %cst_85 {dimension_numbers = #tpu.dot_dimension_numbers<[1], [0], [0], [1], [0, 0, 1, 1], [], []>} : vector<4x36xf32>, vector<36x256xf32>, vector<4x256xf32> -> vector<4x256xf32>
    %c2 = arith.constant 2 : index
    %c0_86 = arith.constant 0 : index
    %c0_87 = arith.constant 0 : index
    %81 = vector.load %arg3[%c2, %c0_86, %c0_87] : memref<3x4x36xf32, #tpu.memory_space<vmem>>, vector<1x4x36xf32>
    %82 = vector.shape_cast %81 : vector<1x4x36xf32> to vector<4x36xf32>
    %cst_88 = arith.constant dense<0.000000e+00> : vector<4x256xf32>
    %83 = tpu.matmul %82, %74, %cst_88 {dimension_numbers = #tpu.dot_dimension_numbers<[1], [0], [0], [1], [0, 0, 1, 1], [], []>} : vector<4x36xf32>, vector<36x256xf32>, vector<4x256xf32> -> vector<4x256xf32>
    %84 = arith.addf %80, %83 : vector<4x256xf32>
    %c0_89 = arith.constant 0 : index
    %c0_90 = arith.constant 0 : index
    %c0_91 = arith.constant 0 : index
    %85 = vector.load %arg4[%c0_89, %c0_90, %c0_91] : memref<2x4x1xf32, #tpu.memory_space<vmem>>, vector<1x4x1xf32>
    %86 = vector.shape_cast %85 : vector<1x4x1xf32> to vector<4x1xf32>
    %87 = vector.broadcast %86 : vector<4x1xf32> to vector<4x256xf32>
    %88 = arith.addf %77, %87 : vector<4x256xf32>
    %c0_92 = arith.constant 0 : index
    %c0_93 = arith.constant 0 : index
    %c0_94 = arith.constant 0 : index
    %89 = vector.load %arg6[%c0_92, %c0_93, %c0_94] : memref<1x4x256xf32, #tpu.memory_space<vmem>>, vector<1x4x256xf32>
    %90 = vector.shape_cast %89 : vector<1x4x256xf32> to vector<4x256xf32>
    %91 = vector.shape_cast %88 : vector<4x256xf32> to vector<1x4x256xf32>
    tpu.vector_store %arg6[%c0_92, %c0_93, %c0_94], %91 {strides = array<i32>} : memref<1x4x256xf32, #tpu.memory_space<vmem>>, vector<1x4x256xf32>,
    %c1_95 = arith.constant 1 : index
    %c0_96 = arith.constant 0 : index
    %c0_97 = arith.constant 0 : index
    %92 = vector.load %arg4[%c1_95, %c0_96, %c0_97] : memref<2x4x1xf32, #tpu.memory_space<vmem>>, vector<1x4x1xf32>
    %93 = vector.shape_cast %92 : vector<1x4x1xf32> to vector<4x1xf32>
    %94 = vector.broadcast %93 : vector<4x1xf32> to vector<4x256xf32>
    %95 = arith.addf %84, %94 : vector<4x256xf32>
    %c0_98 = arith.constant 0 : index
    %c0_99 = arith.constant 0 : index
    %c0_100 = arith.constant 0 : index
    %96 = vector.load %arg7[%c0_98, %c0_99, %c0_100] : memref<1x4x256xf32, #tpu.memory_space<vmem>>, vector<1x4x256xf32>
    %97 = vector.shape_cast %96 : vector<1x4x256xf32> to vector<4x256xf32>
    %98 = vector.shape_cast %95 : vector<4x256xf32> to vector<1x4x256xf32>
    tpu.vector_store %arg7[%c0_98, %c0_99, %c0_100], %98 {strides = array<i32>} : memref<1x4x256xf32, #tpu.memory_space<vmem>>, vector<1x4x256xf32>,
    return
  }
  func.func @transform_0(%arg0: i32) -> (i32, i32, i32) {
    %c0_i32 = arith.constant 0 : i32
    %c0_i32_0 = arith.constant 0 : i32
    %c0_i32_1 = arith.constant 0 : i32
    return %arg0, %c0_i32, %c0_i32_0 : i32, i32, i32
  }
  func.func @transform_1(%arg0: i32) -> (i32, i32, i32) {
    %c0_i32 = arith.constant 0 : i32
    %c0_i32_0 = arith.constant 0 : i32
    %c0_i32_1 = arith.constant 0 : i32
    return %arg0, %c0_i32, %c0_i32_0 : i32, i32, i32
  }
  func.func @transform_2(%arg0: i32) -> (i32, i32, i32) {
    %c0_i32 = arith.constant 0 : i32
    %c0_i32_0 = arith.constant 0 : i32
    %c0_i32_1 = arith.constant 0 : i32
    %c0_i32_2 = arith.constant 0 : i32
    return %c0_i32, %c0_i32_0, %c0_i32_1 : i32, i32, i32
  }
  func.func @transform_3(%arg0: i32) -> (i32, i32, i32) {
    %c0_i32 = arith.constant 0 : i32
    %c0_i32_0 = arith.constant 0 : i32
    %c0_i32_1 = arith.constant 0 : i32
    %c0_i32_2 = arith.constant 0 : i32
    return %c0_i32, %c0_i32_0, %c0_i32_1 : i32, i32, i32
  }
  func.func @transform_4(%arg0: i32) -> (i32, i32) {
    %c0_i32 = arith.constant 0 : i32
    %c0_i32_0 = arith.constant 0 : i32
    %c0_i32_1 = arith.constant 0 : i32
    return %c0_i32, %c0_i32_0 : i32, i32
  }
  func.func @transform_5(%arg0: i32) -> (i32, i32, i32) {
    %c0_i32 = arith.constant 0 : i32
    %c0_i32_0 = arith.constant 0 : i32
    %c0_i32_1 = arith.constant 0 : i32
    return %arg0, %c0_i32, %c0_i32_0 : i32, i32, i32
  }
  func.func @transform_6(%arg0: i32) -> (i32, i32, i32) {
    %c0_i32 = arith.constant 0 : i32
    %c0_i32_0 = arith.constant 0 : i32
    %c0_i32_1 = arith.constant 0 : i32
    return %arg0, %c0_i32, %c0_i32_0 : i32, i32, i32
  }
}

</mosaic_0001>

<bundles_post_ra>
// kernel: tpu_custom_call.1
= control target key start
LH: loop header
LB: loop body
LE: loop exit
PB: predicated region body
PF: predicated region fallthrough
CT: control target
= control target key end

     0   :  { %12 = vsyncpa [#allocation7], 0  ;;  %s1961_s0 = inlined_call_operand.hbm [shape: f32[2,4,256], index: 0, kind: input, shape index: {}]   ;;  %s1962_s1 = inlined_call_operand.hbm [shape: f32[2,4,256], index: 1, kind: input, shape index: {}]   ;;  %s1963_s2 = inlined_call_operand.vmem [shape: f32[3,4,36], index: 2, kind: input, shape index: {}]   ;;  %s1964_s3 = inlined_call_operand.vmem [shape: f32[2,4,1], index: 3, kind: input, shape index: {}]   ;;  %s1965_s4 = inlined_call_operand.vmem [shape: f32[2,256], index: 4, kind: input, shape index: {}]   ;;  %s1966_s5 = inlined_call_operand.hbm [shape: f32[2,4,256], index: 5, kind: output, shape index: {0}]   ;;  %s1967_s6 = inlined_call_operand.hbm [shape: f32[2,4,256], index: 6, kind: output, shape index: {1}]  }
   0x1   :  { %14 = vsyncpa [#allocation7 + $0x1], 0 }
   0x2   :  { %15 = vsyncpa [#allocation10], 0 }
   0x3   :  { %17 = vsyncpa [#allocation10 + $0x1], 0 }
   0x4   :  { %18 = vsyncpa [#allocation8], 0 }
   0x5   :  { %20 = vsyncpa [#allocation8 + $0x1], 0 }
   0x6   :  { %21 = vsyncpa [#allocation13], 0 }
   0x7   :  { %23 = vsyncpa [#allocation13 + $0x1], 0  ;;  %s1509_s21 = smov 0   ;;  %s1511_s22 = smov 0  }
   0x8   :  { %s1513_s23 = smov 0   ;;  %s1515_s24 = smov 0  }
   0x9 LB: > { %s1530_s25 = sadd.s32 4294967295, %s1458_s24   ;;  %s1153_s26 = sadd.s32 4294967294, %s1458_s24   ;;  %s1458_s24 = sphi %s1515_s24, %s1986_s24   ;;  %s1454_s23 = sphi %s1513_s23, %s1985_s23   ;;  %s1450_s22 = sphi %s1511_s22, %s1984_s22   ;;  %s1446_s21 = sphi %s1509_s21, %s1983_s21  }
   0xa   : > { %s1534_s27 = sadd.s32 1, %s1458_s24   ;;  %s36_s28 = sadd.s32 1, %s1454_s23 }
   0xb   : > { %s33_s29 = ssub.s32 %s1458_s24, %s1534_s27  ;;  %p43_p0 = scmp.ne.s32.totalorder %s1454_s23, %s1450_s22 }
   0xc   : > { %p34_p1 = scmp.eq.s32.totalorder %s33_s29, 0  ;;  %p44_p2 = scmp.eq.s32.totalorder %s1458_s24, 0 }
   0xd   : > { %p49_p3 = scmp.ne.s32.totalorder %s1450_s22, %s1446_s21  ;;  %p50_p4 = scmp.eq.s32.totalorder %s1530_s25, 0 }
   0xe   : > { %s1546_s30 = scalar_select %p34_p1, %s1454_s23, %s36_s28  }
   0xf   : > { %p1548_p5 = por %p44_p2, %p43_p0  ;;  %p1552_p6 = por %p50_p4, %p49_p3 }
  0x10   : > { %p162_p7 = scmp.eq.s32.totalorder %s1530_s25, 1  ;;  %p168_p8 = scmp.eq.s32.totalorder %s1153_s26, 1 }
  0x11   : > { %s1971_s8 = scalar_select %p1552_p6, 1, 0 }
  0x12   : > { %p1240_p10 = scmp.lt.s32.totalorder %s1458_s24, 2  ;;  %p1559_p11 = por %p162_p7, %p43_p0 }
  0x13   : > { %p1563_p12 = por %p168_p8, %p49_p3  ;;  %s1568_s11 = sand.u32 1, %s1454_s23  }
  0x14   : > { %s1972_s9 = scalar_select %p1559_p11, 1, 0 }
  0x15   : > { %s1973_s10 = scalar_select %p1563_p12, 1, 0 }
  0x16   : > { %s1188_s12 = sshll.u32 %s1458_s24, 7  ;;  %s1156_s13 = sshll.u32 %s1568_s11, 3 }
  0x17   : > { %s1577_s16 = scalar_lea.hbm %s1961_s0, %s1188_s12  ;;  %s227_s17 = scalar_lea.vmem [#allocation6], %s1156_s13 }
  0x18   : > { %s235_s18 = sshll.u32 %s227_s17, 4  ;;  %p1583_p13 = pnand %p1240_p10, %p1548_p5  ;;  %s1587_s18 = int_to_ptr.vmem [resolvable:$true] %s235_s18 }
  0x19   : > { %s224_s20 = scalar_lea.sflag [#allocation7], %s1568_s11  ;;  %s1296_s26 = scalar_lea.hbm %s1577_s16, 128 }
  0x1a   : > { %p1297_p2 = scmp.ne.s32.totalorder %s1577_s16, %s1296_s26  ;;  %p1298_p3 = pneg %p1583_p13 }
  0x1b   : > { %s1301_s7 = scalar_lea.hbm %s1961_s0, 256  ;;  %p1302_p5 = scmp.lt.u32.totalorder %s1577_s16, %s1961_s0 }
  0x1c   : > { %p1299_p4 = pnand %p1298_p3, %p1297_p2  ;;  %p1303_p8 = scmp.lt.u32.totalorder %s1301_s7, %s1296_s26 }
  0x1d   : > { %p1305_p9 = scmp.lt.u32.totalorder %s1296_s26, %s1577_s16 }
  0x1e   : > { %p1300_p7 = pneg %p1299_p4  ;;  %p1304_p10 = por %p1303_p8, %p1302_p5 }
  0x20   : > { %p1306_p0 = por %p1305_p9, %p1304_p10 }
  0x22   : > { %p1307_p1 = pnand %p1306_p0, %p1300_p7 }
  0x24   : > { %1310 = shalt.err (!%p1307_p1)
}
  0x25   : > { %s1311_s17 = scalar_lea.vmem %s1587_s18, 128  ;;  %s1460_s28 = smov [#allocation6]  }
  0x26   : > { %p1312_p2 = scmp.ne.s32.totalorder %s1587_s18, %s1311_s17  ;;  %s1316_s29 = sshll.u32 %s1460_s28, 4  ;;  %s1317_s29 = int_to_ptr.vmem [resolvable:$false] %s1316_s29 }
  0x27   : > { %s1318_s14 = scalar_lea.vmem %s1317_s29, 256  ;;  %p1319_p11 = scmp.lt.s32.totalorder %s1587_s18, %s1317_s29 }
  0x28   : > { %p1314_p4 = pnand %p1312_p2, %p1298_p3  ;;  %p1320_p5 = scmp.lt.s32.totalorder %s1318_s14, %s1311_s17 }
  0x2a   : > { %p1315_p12 = pneg %p1314_p4  ;;  %p1321_p8 = por %p1320_p5, %p1319_p11 }
  0x2c   : > { %p1322_p9 = pnand %p1321_p8, %p1315_p12 }
  0x2e   : > { %1325 = shalt.err (!%p1322_p9)
}
  0x2f   : > { %1229 = dma.hbm_to_vmem [thread:$0]  (!%p1583_p13), %s1577_s16, 128, %s1587_s18, %s224_s20  }
  0x30   : > { %p1975_p0 = scmp.lt.s32.totalorder %s1458_s24, 3  ;;  %p1976_p1 = scmp.ge.s32.totalorder %s1458_s24, 1 }
  0x31   : > { %s1630_s17 = scalar_lea.hbm %s1962_s1, %s1188_s12  ;;  %s246_s28 = scalar_lea.vmem [#allocation9], %s1156_s13 }
  0x32   : > { %p1621_p7 = pnand %p1976_p1, %p1975_p0  ;;  %s254_s29 = sshll.u32 %s246_s28, 4  ;;  %s255_s29 = int_to_ptr.vmem [resolvable:$true] %s254_s29 }
  0x33   : > { %s243_s16 = scalar_lea.sflag [#allocation10], %s1568_s11  ;;  %s1326_s18 = scalar_lea.hbm %s1630_s17, 128 }
  0x34   : > { %s1977_s26 = scalar_select %p1621_p7, 1, 0 }
  0x35   : > { %p1327_p11 = scmp.ne.s32.totalorder %s1630_s17, %s1326_s18  ;;  %s1331_s12 = scalar_lea.hbm %s1962_s1, 256 }
  0x36   : > { %p1332_p2 = scmp.lt.u32.totalorder %s1630_s17, %s1962_s1  ;;  %p1333_p4 = scmp.lt.u32.totalorder %s1331_s12, %s1326_s18 }
  0x37   : > { %p1329_p12 = pnand %p1327_p11, %p1298_p3  ;;  %p1335_p8 = scmp.lt.u32.totalorder %s1326_s18, %s1630_s17 }
  0x38   : > { %p1334_p5 = por %p1333_p4, %p1332_p2 }
  0x39   : > { %p1330_p10 = pneg %p1329_p12 }
  0x3a   : > { %p1336_p9 = por %p1335_p8, %p1334_p5 }
  0x3c   : > { %p1337_p0 = pnand %p1336_p9, %p1330_p10 }
  0x3e   : > { %1340 = shalt.err (!%p1337_p0)
}
  0x3f   : > { %s1341_s11 = scalar_lea.vmem %s255_s29, 128  ;;  %s1461_s13 = smov [#allocation9]  }
  0x40   : > { %p1342_p1 = scmp.ne.s32.totalorder %s255_s29, %s1341_s11  ;;  %s1346_s28 = sshll.u32 %s1461_s13, 4  ;;  %s1347_s28 = int_to_ptr.vmem [resolvable:$false] %s1346_s28 }
  0x41   : > { %s1348_s20 = scalar_lea.vmem %s1347_s28, 256  ;;  %p1349_p6 = scmp.lt.s32.totalorder %s255_s29, %s1347_s28 }
  0x42   : > { %p1344_p11 = pnand %p1342_p1, %p1298_p3  ;;  %p1350_p7 = scmp.lt.s32.totalorder %s1348_s20, %s1341_s11 }
  0x44   : > { %p1345_p12 = pneg %p1344_p11  ;;  %p1351_p2 = por %p1350_p7, %p1349_p6 }
  0x46   : > { %p1352_p4 = pnand %p1351_p2, %p1345_p12 }
  0x48   : > { %1355 = shalt.err (!%p1352_p4)
}
  0x49   : > { %1232 = dma.hbm_to_vmem [thread:$0]  (!%p1583_p13), %s1630_s17, 128, %s255_s29, %s243_s16  }
  0x4a   : > { %p1978_p10 = scmp.ne.s32.totalorder %s1977_s26, 0 }
  0x4b   : > { %s1657_s18 = sand.u32 (!%p1978_p10), 1, %s1450_s22   ;;  %p1979_p6 = scmp.ne.s32.totalorder (!%p1978_p10), %s1971_s8, 0 }
  0x4c   : > { %263 = sbr.rel (%p1978_p10) target bundleno = 666 (0x29a), region = 40  ;;  %s1660_s14 = sshll.u32 (!%p1978_p10), %s1657_s18, 3 }
  0x4d   : > { %s266_s12 = scalar_lea.sflag (!%p1978_p10), [#allocation7], %s1657_s18  ;;  %s269_s7 = scalar_lea.vmem (!%p1978_p10), [#allocation6], %s1660_s14 }
  0x53   : > { %1429 = dma.done.wait (%p1979_p6), %s266_s12, 128  }
  0x54   : > { %1431 = vsyncadd (%p1979_p6), %s266_s12, 4294967168  ;;  %s275_s19 = scalar_lea.sflag [#allocation10], %s1657_s18  ;;  %s278_s26 = scalar_lea.vmem [#allocation9], %s1660_s14 }
  0x55   : > { %1433 = dma.done.wait (%p1979_p6), %s275_s19, 128  }
  0x56   : > { %1435 = vsyncadd (%p1979_p6), %s275_s19, 4294967168  ;;  %v333_v0 = vlaneseq  ;;  %v1462_v1 = vmov 0.0   ;;  %v325_v5 = vld [vmem:[%s1965_s4] ss:$2 sm:$0x3]  ;;  %v1686_v11 = vld [vmem:[%s278_s26] sm:$0xff] }
  0x57   : > { %321 = vst [vmem:[#allocation3] sm:$0xf] %v1462_v1  ;;  %317 = vst [vmem:[#allocation2] sm:$0xf] %v1462_v1  ;;  %808 = vmatprep.mubr.f32.mxu0 %v1462_v1  ;;  %968 = vmatprep.mubr.f32.mxu1 %v1462_v1  ;;  %v1689_v12 = vld [vmem:[%s269_s7] sm:$0xff]  ;;  %s1463_s15 = smov 127   ;;  %v650_v18 = vcombine.low %v1686_v11, %v1686_v11 }
  0x58   : > { %318 = vst [vmem:[#allocation2 + $0xc] sm:$0xf] %v1462_v1  ;;  %322 = vst [vmem:[#allocation3 + $0xc] sm:$0xf] %v1462_v1  ;;  %v334_v2 = vshrl.u32 %v333_v0, 7  ;;  %s1464_s11 = smov 111  }
  0x59   : > { %v1167_v6 = vld [vmem:[%s1965_s4 + $0x1] ss:$2 sm:$0x3]  ;;  %324 = vst [vmem:[#allocation3 + $0x4] sm:$0xff] %v1686_v11  ;;  %535 = vst [vmem:[#allocation5 + $0x20] sm:$0xf] %v1686_v11 }
  0x5a   : > { %v335_v3 = vsub.s32 0, %v334_v2  ;;  %v339_v4 = vsub.s32 1, %v334_v2  ;;  %320 = vst [vmem:[#allocation2 + $0x4] sm:$0xff] %v1689_v12  ;;  %530 = vst [vmem:[#allocation4 + $0x20] sm:$0xf] %v1689_v12  ;;  %s1465_s13 = smov 15  }
  0x5b   : > { %s1466_s28 = smov 113   ;;  %s1467_s20 = smov 17   ;;  %vm484_vm0 = vcmask 1039360   ;;  %vm398_vm1 = vcmask 130048   ;;  %vm345_vm2 = vcmask 908288   ;;  %vm455_vm3 = vcmask 121856  }
  0x5c   : > { %v336_v7 = vrot.slane %v325_v5, %v335_v3  ;;  %v340_v8 = vrot.slane %v325_v5, %v339_v4  ;;  %v429_v9 = vrot.slane %v1167_v6, %v335_v3  ;;  %v433_v10 = vrot.slane %v1167_v6, %v339_v4  ;;  %s1468_s12 = smov 1   ;;  %s1469_s7 = smov 16  }
  0x5d   : > { %s1470_s19 = smov 112   ;;  %vm438_vm4 = vcmask 924672   ;;  %vm641_vm5 = vcmask 916480   ;;  %vm502_vm6 = vcmask 7168   ;;  %vm362_vm7 = vcmask 138240   ;;  %s316_s26 = scalar_lea.vmem [#allocation12], %s1660_s14 }
  0x5e   : > { %v341_v13 = vcombine.low %v336_v7, %v340_v8  ;;  %v434_v14 = vcombine.low %v429_v9, %v433_v10  ;;  %vm737_vm8 = vcmask 1043456   ;;  %vm733_vm9 = vcmask 293888   ;;  %s1028_s17 = sshll.u32 %s316_s26, 4  ;;  %p1980_p3 = scmp.ne.s32.totalorder %s1972_s9, 0  ;;  %s1897_s17 = int_to_ptr.vmem [resolvable:$true] %s1028_s17 }
  0x5f   : > { %v1289_v19 = vld [vmem:[#allocation3 + $0xc] ss:$0 sps:$4 sm:$0xff]   ;;  %v1292_v23 = vld [vmem:[#allocation2 + $0xc] ss:$0 sps:$4 sm:$0xff]  }
  0x60   : > { %481 = vrot.lane.b32.xlu1 %v341_v13, %s1463_s15  ;;  %342 = vrot.lane.b32.xlu0 %v341_v13, %s1464_s11  ;;  %v1286_v15 = vld [vmem:[#allocation3 + $0x8] ss:$0 sps:$4 sm:$0xff]   ;;  %v1700_v16 = vld [vmem:[#allocation3] sm:$0xff]  ;;  %v586_v40 = vld [vmem:[#allocation3 + $0xc] sm:$0xf] }
  0x61   : > { %v407_v17 = vcombine.low %v1700_v16, %v1700_v16  ;;  %v1290_v20 = vld [vmem:[#allocation2 + $0x8] ss:$0 sps:$4 sm:$0xff]   ;;  %v1711_v21 = vld [vmem:[#allocation2] sm:$0xff]  ;;  %v331_v26 = vld [vmem:[#allocation3 + $0x8] sm:$0xf] }
  0x62   : > { %v390_v22 = vcombine.low %v1711_v21, %v1711_v21  ;;  %v329_v27 = vld [vmem:[#allocation2 + $0x8] sm:$0xf]  ;;  %v424_v33 = vld [vmem:[#allocation3 + $0x8] sm:$0xf]  ;;  %v667_v41 = vld [vmem:[#allocation3 + $0xc] sm:$0xf] }
  0x63   : > { %v422_v34 = vld [vmem:[#allocation2 + $0x8] sm:$0xf]  ;;  %v584_v48 = vld [vmem:[#allocation2 + $0xc] sm:$0xf] }
  0x64   : > { %587 = vrot.lane.b32.xlu1 %v341_v13, %s1465_s13  ;;  %435 = vrot.lane.b32.xlu0 %v434_v14, %s1466_s28 }
  0x68   : > { %668 = vrot.lane.b32.xlu1 %v434_v14, %s1467_s20  ;;  %541 = vrot.lane.b32.xlu0 %v434_v14, %s1468_s12  ;;  %v478_v14 = vld [vmem:[#allocation2 + $0x8] sm:$0xf] }
  0x6c   : > { %413 = vrot.lane.b32.xlu1 %v1286_v15, %s1469_s7  ;;  %411 = vrot.lane.b32.xlu0 %v1700_v16, %s1469_s7 }
  0x70   : > { %654 = vrot.lane.b32.xlu0 %v1686_v11, %s1470_s19  ;;  %409 = vrot.lane.b32.xlu1 %v407_v17, %s1469_s7 }
  0x74   : > { %652 = vrot.lane.b32.xlu0 %v650_v18, %s1470_s19  ;;  %656 = vrot.lane.b32.xlu1 %v1289_v19, %s1470_s19 }
  0x78   : > { %396 = vrot.lane.b32.xlu0 %v1290_v20, %s1469_s7  ;;  %394 = vrot.lane.b32.xlu1 %v1711_v21, %s1469_s7 }
  0x7c   : > { %392 = vrot.lane.b32.xlu0 %v390_v22, %s1469_s7  ;;  %639 = vrot.lane.b32.xlu1 %v1292_v23, %s1470_s19  ;;  %v480_v23 = vld [vmem:[#allocation3 + $0x8] sm:$0xf]  ;;  %s309_s7 = scalar_lea.vmem [#allocation11], %s1660_s14  ;;  %s995_s14 = scalar_lea.sflag [#allocation8], %s1657_s18 }
  0x80   : > { %637 = vrot.lane.b32.xlu0 %v1689_v12, %s1470_s19 }
  0xd2   : > { %v482_v24 = vpop.permute.xlu1 %481  ;;  %v343_v25 = vpop.permute.xlu0 %342 }
  0xd3   : > { %v344_v28 = vrot.slane %v343_v25, 4  ;;  %v1721_v38 = vrot.slane %v482_v24, 4 }
  0xd5   : > { %v352_v29 = vmul.f32 %v344_v28, %v331_v26  ;;  %v350_v30 = vmul.f32 %v344_v28, %v329_v27  ;;  %v485_v47 = vsel %vm484_vm0, %v1721_v38, %v482_v24  ;;  %v346_v54 = vsel %vm345_vm2, %v344_v28, %v343_v25 }
  0xd6   : > { %v588_v31 = vpop.permute.xlu1 %587  ;;  %v436_v32 = vpop.permute.xlu0 %435  ;;  %v1736_v51 = vmul.f32 %v485_v47, %v1700_v16  ;;  %v351_v60 = vmul.f32 %v1700_v16, %v346_v54  ;;  %v488_v5 = vmul.f32 %v485_v47, %v1711_v21  ;;  %v349_v13 = vmul.f32 %v1711_v21, %v346_v54 }
  0xd7   : > { %v437_v35 = vrot.slane %v436_v32, 4  ;;  %376 = vrot.lane.b32.xlu1 %v352_v29, %s1467_s20  ;;  %360 = vrot.lane.b32.xlu0 %v350_v30, %s1467_s20  ;;  %v589_v43 = vrot.slane %v588_v31, 4  ;;  %v489_v20 = vmul.f32 %v1721_v38, %v478_v14  ;;  %v491_v27 = vmul.f32 %v1721_v38, %v480_v23  ;;  %v540_v29 = vld [vmem:[#allocation3 + $0xc] sm:$0xf] }
  0xd8   : > { %v533_v28 = vcombine.high %v1686_v11, %v1686_v11  ;;  %v371_v30 = vcombine.high %v351_v60, %v351_v60  ;;  %v1471_v54 = vmov 0  }
  0xd9   : > { %v445_v36 = vmul.f32 %v437_v35, %v424_v33  ;;  %v443_v37 = vmul.f32 %v437_v35, %v422_v34  ;;  %v596_v45 = vmul.f32 %v589_v43, %v586_v40  ;;  %v594_v52 = vmul.f32 %v589_v43, %v584_v48  ;;  %v538_v34 = vld [vmem:[#allocation2 + $0xc] sm:$0xf]  ;;  %1285 = vset.pattern.permute.xlu1 %v1471_v54 }
  0xda   : > { %v1723_v39 = vpop.permute.xlu1 %668  ;;  %v542_v42 = vpop.permute.xlu0 %541  ;;  %v1741_v55 = vsel %vm455_vm3, %v589_v43, %v588_v31  ;;  %v439_v62 = vsel %vm438_vm4, %v437_v35, %v436_v32  ;;  %v495_v26 = vcombine.low %v489_v20, %v489_v20  ;;  %536 = vst [vmem:[#allocation5 + $0x28] sm:$0xf] %v533_v28  ;;  %v512_v31 = vcombine.low %v491_v27, %v491_v27 }
  0xdb   : > { %v1726_v44 = vrot.slane %v1723_v39, 4  ;;  %469 = vrot.lane.b32.xlu1 %v445_v36, %s1465_s13  ;;  %453 = vrot.lane.b32.xlu0 %v443_v37, %s1465_s13  ;;  %v543_v59 = vrot.slane %v542_v42, 4  ;;  %v1750_v61 = vmul.f32 %v1741_v55, %v1686_v11  ;;  %v444_v6 = vmul.f32 %v439_v62, %v1700_v16 }
  0xdc   : > { %v442_v18 = vmul.f32 %v439_v62, %v1711_v21  ;;  %v528_v33 = vcombine.high %v1689_v12, %v1689_v12  ;;  %v511_v40 = vcombine.low %v1736_v51, %v1736_v51  ;;  %v355_v43 = vcombine.high %v349_v13, %v349_v13  ;;  %1284 = vset.pattern.permute.xlu0 %v1471_v54 }
  0xdd   : > { %v677_v46 = vmul.f32 %v1726_v44, %v667_v41  ;;  %v544_v4 = vsel %vm502_vm6, %v543_v59, %v542_v42  ;;  %v671_v22 = vsel %vm362_vm7, %v1726_v44, %v1723_v39  ;;  %v550_v32 = vmul.f32 %v543_v59, %v540_v29 }
  0xde   : > { %v414_v49 = vpop.permute.xlu1 %413  ;;  %v412_v50 = vpop.permute.xlu0 %411  ;;  %v549_v9 = vmul.f32 %v544_v4, %v1686_v11  ;;  %v547_v19 = vmul.f32 %v544_v4, %v1689_v12  ;;  %v676_v21 = vmul.f32 %v671_v22, %v1686_v11  ;;  %531 = vst [vmem:[#allocation4 + $0x28] sm:$0xf] %v528_v33  ;;  %v464_v35 = vcombine.high %v444_v6, %v444_v6 }
  0xdf   : > { %619 = vrot.lane.b32.xlu1 %v596_v45, %s1466_s28  ;;  %700 = vrot.lane.b32.xlu0 %v677_v46, %s1464_s11  ;;  %v416_v53 = vsel %vm398_vm1, %v412_v50, %v414_v49  ;;  %v570_v11 = vcombine.low %v550_v32, %v550_v32  ;;  %v548_v36 = vmul.f32 %v543_v59, %v538_v34 }
  0xe0   : > { %420 = vst [vmem:[#allocation5 + $0x8] sm:$0xf0] %v416_v53  ;;  %v614_v37 = vcombine.high %v1750_v61, %v1750_v61  ;;  %v569_v39 = vcombine.low %v549_v9, %v549_v9  ;;  %v593_v41 = vmul.f32 %v1741_v55, %v1689_v12  ;;  %v494_v42 = vcombine.low %v488_v5, %v488_v5  ;;  %v895_v55 = vld [vmem:[%s1964_s3] sm:$0xf] }
  0xe1   : > { %v554_v38 = vcombine.low %v548_v36, %v548_v36  ;;  %v448_v46 = vcombine.high %v442_v18, %v442_v18  ;;  %v553_v47 = vcombine.low %v547_v19, %v547_v19  ;;  %v695_v48 = vcombine.high %v676_v21, %v676_v21 }
  0xe2   : > { %v655_v56 = vpop.permute.xlu0 %654  ;;  %v410_v57 = vpop.permute.xlu1 %409  ;;  %v599_v45 = vcombine.high %v593_v41, %v593_v41  ;;  %v633_v49 = vcombine.low %v1689_v12, %v1689_v12 }
  0xe3   : > { %604 = vrot.lane.b32.xlu1 %v594_v52, %s1466_s28  ;;  %515 = vrot.lane.b32.xlu0 %v1736_v51, %s1468_s12  ;;  %v415_v58 = vsel %vm398_vm1, %v410_v57, %v412_v50  ;;  %v674_v50 = vmul.f32 %v671_v22, %v1689_v12  ;;  %v665_v51 = vld [vmem:[#allocation2 + $0xc] sm:$0xf]  ;;  %v1179_v12 = vld [vmem:[%s1964_s3 + $0x4] sm:$0xf] }
  0xe4   : > { %419 = vst [vmem:[#allocation5] sm:$0xf0] %v415_v58  ;;  %v675_v52 = vmul.f32 %v1726_v44, %v665_v51 }
  0xe5   : > { %v680_v53 = vcombine.high %v674_v50, %v674_v50 }
  0xe6   : > { %v653_v63 = vpop.permute.xlu0 %652  ;;  %v657_v0 = vpop.permute.xlu1 %656 }
  0xe7   : > { %615 = vrot.lane.b32.xlu1 %v1750_v61, %s1466_s28  ;;  %372 = vrot.lane.b32.xlu0 %v351_v60, %s1467_s20  ;;  %v658_v2 = vsel %vm641_vm5, %v653_v63, %v655_v56  ;;  %v659_v3 = vsel %vm641_vm5, %v655_v56, %v657_v0 }
  0xe8   : > { %662 = vst [vmem:[#allocation5 + $0x30] sm:$0xf0] %v658_v2  ;;  %663 = vst [vmem:[#allocation5 + $0x38] sm:$0xf0] %v659_v3 }
  0xea   : > { %v397_v7 = vpop.permute.xlu0 %396  ;;  %v395_v8 = vpop.permute.xlu1 %394 }
  0xeb   : > { %498 = vrot.lane.b32.xlu1 %v488_v5, %s1468_s12  ;;  %465 = vrot.lane.b32.xlu0 %v444_v6, %s1465_s13  ;;  %v400_v10 = vsel %vm398_vm1, %v395_v8, %v397_v7 }
  0xec   : > { %404 = vst [vmem:[#allocation4 + $0x8] sm:$0xf0] %v400_v10 }
  0xee   : > { %v393_v15 = vpop.permute.xlu0 %392  ;;  %v640_v17 = vpop.permute.xlu1 %639 }
  0xef   : > { %573 = vrot.lane.b32.xlu0 %v549_v9, %s1463_s15  ;;  %356 = vrot.lane.b32.xlu1 %v349_v13, %s1467_s20  ;;  %v399_v16 = vsel %vm398_vm1, %v393_v15, %v395_v8 }
  0xf0   : > { %403 = vst [vmem:[#allocation4] sm:$0xf0] %v399_v16 }
  0xf2   : > { %v1775_v24 = vpop.permute.xlu0 %637 }
  0xf3   : > { %557 = vrot.lane.b32.xlu0 %v547_v19, %s1463_s15  ;;  %449 = vrot.lane.b32.xlu1 %v442_v18, %s1465_s13  ;;  %v643_v25 = vsel %vm641_vm5, %v1775_v24, %v640_v17 }
  0xf4   : > { %647 = vst [vmem:[#allocation4 + $0x38] sm:$0xf0] %v643_v25 }
  0xf7   : > { %500 = vrot.lane.b32.xlu0 %v495_v26, %s1468_s12  ;;  %696 = vrot.lane.b32.xlu1 %v676_v21, %s1464_s11 }
  0xfb   : > { %374 = vrot.lane.b32.xlu0 %v371_v30, %s1467_s20  ;;  %517 = vrot.lane.b32.xlu1 %v512_v31, %s1468_s12 }
  0xff   : > { %467 = vrot.lane.b32.xlu0 %v464_v35, %s1465_s13  ;;  %575 = vrot.lane.b32.xlu1 %v570_v11, %s1463_s15 }
 0x103   : > { %617 = vrot.lane.b32.xlu0 %v614_v37, %s1466_s28  ;;  %559 = vrot.lane.b32.xlu1 %v554_v38, %s1463_s15 }
 0x107   : > { %571 = vrot.lane.b32.xlu0 %v569_v39, %s1463_s15  ;;  %513 = vrot.lane.b32.xlu1 %v511_v40, %s1468_s12 }
 0x10b   : > { %496 = vrot.lane.b32.xlu0 %v494_v42, %s1468_s12  ;;  %358 = vrot.lane.b32.xlu1 %v355_v43, %s1467_s20  ;;  %s1190_s12 = sshll.u32 %s1530_s25, 7 }
 0x10c   : > { %s1888_s16 = scalar_lea.hbm %s1966_s5, %s1190_s12 }
 0x10f   : > { %602 = vrot.lane.b32.xlu0 %v599_v45, %s1466_s28  ;;  %451 = vrot.lane.b32.xlu1 %v448_v46, %s1465_s13 }
 0x113   : > { %555 = vrot.lane.b32.xlu0 %v553_v47, %s1463_s15  ;;  %698 = vrot.lane.b32.xlu1 %v695_v48, %s1464_s11 }
 0x117   : > { %635 = vrot.lane.b32.xlu0 %v633_v49, %s1470_s19  ;;  %600 = vrot.lane.b32.xlu1 %v593_v41, %s1466_s28  ;;  %s1014_s19 = sshll.u32 %s309_s7, 4  ;;  %s1472_s28 = smov [#allocation11]   ;;  %s1890_s19 = int_to_ptr.vmem [resolvable:$true] %s1014_s19 }
 0x118   : > { %s1356_s13 = scalar_lea.vmem %s1890_s19, 128  ;;  %s1360_s20 = sshll.u32 %s1472_s28, 4  ;;  %s1361_s20 = int_to_ptr.vmem [resolvable:$false] %s1360_s20 }
 0x119   : > { %p1357_p13 = scmp.ne.s32.totalorder %s1890_s19, %s1356_s13  ;;  %s1362_s8 = scalar_lea.vmem %s1361_s20, 256 }
 0x11a   : > { %p1363_p8 = scmp.lt.s32.totalorder %s1890_s19, %s1361_s20  ;;  %p1364_p9 = scmp.lt.s32.totalorder %s1362_s8, %s1356_s13 }
 0x11b   : > { %685 = vrot.lane.b32.xlu0 %v675_v52, %s1464_s11  ;;  %683 = vrot.lane.b32.xlu1 %v680_v53, %s1464_s11  ;;  %p1358_p7 = pnand %p1357_p13, %p1980_p3 }
 0x11c   : > { %p1365_p0 = por %p1364_p9, %p1363_p8 }
 0x11d   : > { %p1359_p5 = pneg %p1358_p7 }
 0x11f   : > { %681 = vrot.lane.b32.xlu1 %v674_v50, %s1464_s11  ;;  %898 = vperm.xlu0 %1284, %v895_v55   ;;  %s1895_s11 = scalar_lea.hbm %s1967_s6, %s1190_s12  ;;  %p1366_p1 = pnand %p1365_p0, %p1359_p5 }
 0x123   : > { %984 = vperm.xlu1 %1285, %v1179_v12  }
 0x149   : > { %v377_v44 = vpop.permute.xlu1 %376  ;;  %v361_v56 = vpop.permute.xlu0 %360 }
 0x14d   : > { %v470_v57 = vpop.permute.xlu1 %469  ;;  %v1824_v58 = vpop.permute.xlu0 %453 }
 0x151   : > { %v620_v59 = vpop.permute.xlu1 %619  ;;  %v1826_v60 = vpop.permute.xlu0 %700 }
 0x155   : > { %v605_v61 = vpop.permute.xlu1 %604  ;;  %v516_v62 = vpop.permute.xlu0 %515 }
 0x159   : > { %v616_v63 = vpop.permute.xlu1 %615  ;;  %v373_v0 = vpop.permute.xlu0 %372 }
 0x15d   : > { %v499_v2 = vpop.permute.xlu1 %498  ;;  %v466_v3 = vpop.permute.xlu0 %465 }
 0x161   : > { %v574_v4 = vpop.permute.xlu0 %573  ;;  %v357_v5 = vpop.permute.xlu1 %356 }
 0x165   : > { %v1828_v6 = vpop.permute.xlu0 %557  ;;  %v450_v7 = vpop.permute.xlu1 %449 }
 0x169   : > { %v501_v8 = vpop.permute.xlu0 %500  ;;  %v1830_v9 = vpop.permute.xlu1 %696 }
 0x16a   : > { %v504_v10 = vsel %vm502_vm6, %v499_v2, %v501_v8 }
 0x16b   : > { %508 = vst [vmem:[#allocation4 + $0x18] sm:$0xf0] %v504_v10  ;;  %v1169_v10 = vld [vmem:[%s1963_s2 + $0x8] sm:$0xf] }
 0x16d   : > { %v375_v13 = vpop.permute.xlu0 %374  ;;  %v518_v14 = vpop.permute.xlu1 %517 }
 0x16e   : > { %v378_v15 = vsel %vm362_vm7, %v373_v0, %v375_v13  ;;  %v379_v16 = vsel %vm362_vm7, %v375_v13, %v377_v44  ;;  %v520_v17 = vsel %vm502_vm6, %v516_v62, %v518_v14 }
 0x16f   : > { %382 = vst [vmem:[#allocation5] sm:$0xf] %v378_v15  ;;  %383 = vst [vmem:[#allocation5 + $0x8] sm:$0xf] %v379_v16 }
 0x170   : > { %524 = vst [vmem:[#allocation5 + $0x18] sm:$0xf0] %v520_v17 }
 0x171   : > { %v468_v18 = vpop.permute.xlu0 %467  ;;  %v576_v19 = vpop.permute.xlu1 %575 }
 0x172   : > { %v471_v20 = vsel %vm455_vm3, %v466_v3, %v468_v18  ;;  %v472_v22 = vsel %vm455_vm3, %v468_v18, %v470_v57  ;;  %v578_v23 = vsel %vm484_vm0, %v574_v4, %v576_v19 }
 0x173   : > { %475 = vst [vmem:[#allocation5 + $0x10] sm:$0xf] %v471_v20  ;;  %476 = vst [vmem:[#allocation5 + $0x18] sm:$0xf] %v472_v22  ;;  %v1168_v22 = vld [vmem:[%s1963_s2 + $0x4] sm:$0xf] }
 0x174   : > { %582 = vst [vmem:[#allocation5 + $0x28] sm:$0xf0] %v578_v23 }
 0x175   : > { %v618_v25 = vpop.permute.xlu0 %617  ;;  %v560_v21 = vpop.permute.xlu1 %559 }
 0x176   : > { %v621_v26 = vsel %vm438_vm4, %v616_v63, %v618_v25  ;;  %v622_v27 = vsel %vm438_vm4, %v618_v25, %v620_v59  ;;  %v562_v28 = vsel %vm484_vm0, %v1828_v6, %v560_v21  ;;  %v719_v33 = vld [vmem:[#allocation5 + $0x8] sm:$0xff]  ;;  %v718_v47 = vld [vmem:[#allocation5] sm:$0xff] }
 0x177   : > { %625 = vst [vmem:[#allocation5 + $0x30] sm:$0xf] %v621_v26  ;;  %626 = vst [vmem:[#allocation5 + $0x38] sm:$0xf] %v622_v27 }
 0x178   : > { %566 = vst [vmem:[#allocation4 + $0x28] sm:$0xf0] %v562_v28 }
 0x179   : > { %v572_v29 = vpop.permute.xlu0 %571  ;;  %v514_v30 = vpop.permute.xlu1 %513 }
 0x17a   : > { %v577_v31 = vsel %vm484_vm0, %v572_v29, %v574_v4  ;;  %v519_v32 = vsel %vm502_vm6, %v514_v30, %v516_v62  ;;  %v721_v34 = vld [vmem:[#allocation5 + $0x18] sm:$0xff] }
 0x17b   : > { %581 = vst [vmem:[#allocation5 + $0x20] sm:$0xf0] %v577_v31  ;;  %523 = vst [vmem:[#allocation5 + $0x10] sm:$0xf0] %v519_v32  ;;  %v1192_v35 = vpack.c.bf16 %v721_v34, %v719_v33  ;;  %v723_v50 = vld [vmem:[#allocation5 + $0x28] sm:$0xff] }
 0x17d   : > { %v497_v11 = vpop.permute.xlu0 %496  ;;  %1193 = vmatprep.subr.bf16.mxu0 %v1192_v35  ;;  %v359_v36 = vpop.permute.xlu1 %358 }
 0x17e   : > { %v503_v37 = vsel %vm502_vm6, %v497_v11, %v499_v2  ;;  %v363_v38 = vsel %vm362_vm7, %v357_v5, %v359_v36  ;;  %v364_v39 = vsel %vm362_vm7, %v359_v36, %v361_v56  ;;  %v725_v42 = vld [vmem:[#allocation5 + $0x38] sm:$0xff]  ;;  %v724_v56 = vld [vmem:[#allocation5 + $0x30] sm:$0xff] }
 0x17f   : > { %507 = vst [vmem:[#allocation4 + $0x10] sm:$0xf0] %v503_v37  ;;  %367 = vst [vmem:[#allocation4] sm:$0xf] %v363_v38  ;;  %v1196_v51 = vpack.c.bf16 %v725_v42, %v723_v50 }
 0x180   : > { %368 = vst [vmem:[#allocation4 + $0x8] sm:$0xf] %v364_v39 }
 0x181   : > { %v603_v40 = vpop.permute.xlu0 %602  ;;  %v452_v41 = vpop.permute.xlu1 %451 }
 0x182   : > { %v607_v43 = vsel %vm438_vm4, %v603_v40, %v605_v61  ;;  %v456_v45 = vsel %vm455_vm3, %v450_v7, %v452_v41  ;;  %v457_v46 = vsel %vm455_vm3, %v452_v41, %v1824_v58  ;;  %v720_v48 = vld [vmem:[#allocation5 + $0x10] sm:$0xff]  ;;  %v722_v52 = vld [vmem:[#allocation5 + $0x20] sm:$0xff] }
 0x183   : > { %611 = vst [vmem:[#allocation4 + $0x38] sm:$0xf] %v607_v43  ;;  %460 = vst [vmem:[#allocation4 + $0x10] sm:$0xf] %v456_v45  ;;  %v1194_v49 = vpack.c.bf16 %v720_v48, %v718_v47  ;;  %v1198_v57 = vpack.c.bf16 %v724_v56, %v722_v52 }
 0x184   : > { %461 = vst [vmem:[#allocation4 + $0x18] sm:$0xf] %v457_v46 }
 0x185   : > { %v556_v53 = vpop.permute.xlu0 %555  ;;  %1195 = vmatpush1.bf16.msra.mxu0 %v1194_v49  ;;  %v699_v54 = vpop.permute.xlu1 %698 }
 0x186   : > { %v561_v55 = vsel %vm484_vm0, %v556_v53, %v1828_v6  ;;  %v702_v12 = vsel %vm345_vm2, %v1830_v9, %v699_v54  ;;  %v703_v44 = vsel %vm345_vm2, %v699_v54, %v1826_v60  ;;  %1197 = vmatprep.subr.bf16.mxu0 %v1196_v51  ;;  %v708_v62 = vld [vmem:[#allocation4] sm:$0xff]  ;;  %v713_v6 = vld [vmem:[#allocation4 + $0x28] sm:$0xff] }
 0x187   : > { %565 = vst [vmem:[#allocation4 + $0x20] sm:$0xf0] %v561_v55  ;;  %706 = vst [vmem:[#allocation5 + $0x40] sm:$0xf] %v702_v12  ;;  %v709_v61 = vld [vmem:[#allocation4 + $0x8] sm:$0xff] }
 0x188   : > { %707 = vst [vmem:[#allocation5 + $0x48] sm:$0xf] %v703_v44 }
 0x189   : > { %v636_v58 = vpop.permute.xlu0 %635  ;;  %1199 = vmatpush1.bf16.msra.mxu0 %v1198_v57  ;;  %v601_v59 = vpop.permute.xlu1 %600 }
 0x18a   : > { %v642_v63 = vsel %vm641_vm5, %v636_v58, %v1775_v24  ;;  %v606_v0 = vsel %vm438_vm4, %v601_v59, %v603_v40  ;;  %v710_v3 = vld [vmem:[#allocation4 + $0x10] sm:$0xff]  ;;  %v715_v4 = vld [vmem:[#allocation4 + $0x38] sm:$0xff] }
 0x18b   : > { %v711_v2 = vld [vmem:[#allocation4 + $0x18] sm:$0xff]  ;;  %646 = vst [vmem:[#allocation4 + $0x30] sm:$0xf0] %v642_v63  ;;  %610 = vst [vmem:[#allocation4 + $0x30] sm:$0xf] %v606_v0  ;;  %v1202_v5 = vpack.c.bf16 %v710_v3, %v708_v62  ;;  %v1204_v9 = vpack.c.bf16 %v715_v4, %v713_v6 }
 0x18c   : > { %v1200_v60 = vpack.c.bf16 %v711_v2, %v709_v61 }
 0x18d   : > { %v686_v7 = vpop.permute.xlu0 %685  ;;  %v684_v8 = vpop.permute.xlu1 %683 }
 0x18e   : > { %1209 = vmatprep.subr.bf16.mxu1 %v1200_v60  ;;  %v688_v24 = vsel %vm345_vm2, %v684_v8, %v686_v7  ;;  %v726_v14 = vld [vmem:[#allocation5 + $0x40] sm:$0xf]  ;;  %v712_v17 = vld [vmem:[#allocation4 + $0x20] sm:$0xff] }
 0x18f   : > { %1211 = vmatpush1.bf16.msra.mxu1 %v1202_v5  ;;  %v727_v13 = vld [vmem:[#allocation5 + $0x48] sm:$0xf]  ;;  %692 = vst [vmem:[#allocation4 + $0x48] sm:$0xf] %v688_v24 }
 0x190   : > { %1170 = vmatprep.subr.msk.mxu0 %vm737_vm8, %v727_v13  ;;  %1213 = vmatprep.subr.bf16.mxu1 %v1204_v9 }
 0x191   : > { %1171 = vmatpush1.msk.msra.mxu0 %vm737_vm8, %v726_v14  ;;  %v682_v15 = vpop.permute.xlu1 %681 }
 0x192   : > { %1201 = vmatprep.subr.bf16.mxu0 %v1200_v60  ;;  %1172 = vmatmul.mubr.msk.f32.vlgmr.msra.gmra.mrb[0].mxu0 %vm733_vm9, %v1169_v10  ;;  %v687_v16 = vsel %vm345_vm2, %v682_v15, %v684_v8  ;;  %v714_v18 = vld [vmem:[#allocation4 + $0x30] sm:$0xff] }
 0x193   : > { %1203 = vmatpush1.bf16.msra.mxu0 %v1202_v5  ;;  %888 = vmatprep.mubr.f32.mxu0 %v1462_v1  ;;  %691 = vst [vmem:[#allocation4 + $0x40] sm:$0xf] %v687_v16  ;;  %v1206_v19 = vpack.c.bf16 %v714_v18, %v712_v17  ;;  %v728_v1 = vld [vmem:[%s1963_s2] sm:$0xf] }
 0x194   : > { %1205 = vmatprep.subr.bf16.mxu0 %v1204_v9 }
 0x195   : > { %1215 = vmatpush1.bf16.msra.mxu1 %v1206_v19 }
 0x196   : > { %v717_v20 = vld [vmem:[#allocation4 + $0x48] sm:$0xf] }
 0x197   : > { %1207 = vmatpush1.bf16.msra.mxu0 %v1206_v19  ;;  %1176 = vmatprep.subr.msk.mxu1 %vm737_vm8, %v717_v20 }
 0x198   : > { %1173 = vmatprep.subr.msk.mxu0 %vm737_vm8, %v717_v20 }
 0x19a   : > { %v716_v23 = vld [vmem:[#allocation4 + $0x40] sm:$0xf] }
 0x19b   : > { %1174 = vmatpush1.msk.msra.mxu0 %vm737_vm8, %v716_v23  ;;  %1177 = vmatpush1.msk.msra.mxu1 %vm737_vm8, %v716_v23 }
 0x19c   : > { %1175 = vmatmul.mubr.msk.f32.vlgmr.msra.gmra.mrb[0].mxu0 %vm733_vm9, %v1168_v22  ;;  %1178 = vmatmul.mubr.msk.f32.vlgmr.msra.gmra.mrb[0].mxu1 %vm733_vm9, %v728_v1 }
 0x19e   : > { %v899_v21 = vpop.permute.xlu0 %898 }
 0x1a2   : > { %v985_v25 = vpop.permute.xlu1 %984 }
 0x26f   : > { %v890_v26 = vpop.f32.mrb[0].mxu0  ;;  %v970_v27 = vpop.f32.mrb[0].mxu1 }
 0x270   : > { %v987_v28 = vadd.f32 %v985_v25, %v890_v26  ;;  %v971_v29 = vadd.f32 %v970_v27, %v899_v21  ;;  %v892_v30 = vpop.f32.mrb[1].mxu0  ;;  %v972_v31 = vpop.f32.mrb[1].mxu1 }
 0x271   : > { %v988_v32 = vadd.f32 %v985_v25, %v892_v30  ;;  %v973_v33 = vadd.f32 %v972_v31, %v899_v21 }
 0x273   : > { %v991_v34 = vcombine.low %v987_v28, %v988_v32  ;;  %v977_v35 = vcombine.low %v971_v29, %v973_v33 }
 0x275   : > { %979 = vst [vmem:[%s309_s7] sm:$0xff] %v977_v35  ;;  %993 = vst [vmem:[%s316_s26] sm:$0xff] %v991_v34 }
 0x276   : > { %1369 = shalt.err (!%p1366_p1)
}
 0x277   : > { %s1370_s12 = scalar_lea.hbm %s1888_s16, 128  ;;  %s1374_s29 = scalar_lea.hbm %s1966_s5, 256 }
 0x278   : > { %p1371_p11 = scmp.ne.s32.totalorder %s1888_s16, %s1370_s12  ;;  %p1375_p4 = scmp.lt.u32.totalorder %s1888_s16, %s1966_s5 }
 0x279   : > { %p1376_p10 = scmp.lt.u32.totalorder %s1374_s29, %s1370_s12  ;;  %p1378_p13 = scmp.lt.u32.totalorder %s1370_s12, %s1888_s16 }
 0x27a   : > { %p1372_p12 = pnand %p1371_p11, %p1980_p3 }
 0x27b   : > { %p1377_p6 = por %p1376_p10, %p1375_p4 }
 0x27c   : > { %p1373_p2 = pneg %p1372_p12 }
 0x27d   : > { %p1379_p7 = por %p1378_p13, %p1377_p6 }
 0x27f   : > { %p1380_p5 = pnand %p1379_p7, %p1373_p2 }
 0x281   : > { %1383 = shalt.err (!%p1380_p5)
}
 0x282   : > { %1222 = dma.vmem_to_hbm [thread:$0]  (%p1980_p3), %s1890_s19, 128, %s1888_s16, %s995_s14  }
 0x283   : > { %s1000_s13 = scalar_lea.sflag [#allocation13], %s1657_s18  ;;  %s1384_s28 = scalar_lea.vmem %s1897_s17, 128 }
 0x284   : > { %p1385_p8 = scmp.ne.s32.totalorder %s1897_s17, %s1384_s28  ;;  %s1473_s20 = smov [#allocation12]  }
 0x285   : > { %s1388_s8 = sshll.u32 %s1473_s20, 4  ;;  %s1389_s8 = int_to_ptr.vmem [resolvable:$false] %s1388_s8 }
 0x286   : > { %p1386_p9 = pnand %p1385_p8, %p1980_p3  ;;  %s1390_s12 = scalar_lea.vmem %s1389_s8, 256 }
 0x287   : > { %p1391_p1 = scmp.lt.s32.totalorder %s1897_s17, %s1389_s8  ;;  %p1392_p11 = scmp.lt.s32.totalorder %s1390_s12, %s1384_s28 }
 0x288   : > { %p1387_p0 = pneg %p1386_p9 }
 0x289   : > { %p1393_p12 = por %p1392_p11, %p1391_p1 }
 0x28b   : > { %p1394_p2 = pnand %p1393_p12, %p1387_p0 }
 0x28d   : > { %1397 = shalt.err (!%p1394_p2)
}
 0x28e   : > { %s1398_s18 = scalar_lea.hbm %s1895_s11, 128  ;;  %s1402_s14 = scalar_lea.hbm %s1967_s6, 256 }
 0x28f   : > { %p1399_p4 = scmp.ne.s32.totalorder %s1895_s11, %s1398_s18  ;;  %p1403_p13 = scmp.lt.u32.totalorder %s1895_s11, %s1967_s6 }
 0x290   : > { %p1404_p7 = scmp.lt.u32.totalorder %s1402_s14, %s1398_s18  ;;  %p1406_p8 = scmp.lt.u32.totalorder %s1398_s18, %s1895_s11 }
 0x291   : > { %p1400_p10 = pnand %p1399_p4, %p1980_p3 }
 0x292   : > { %p1405_p5 = por %p1404_p7, %p1403_p13 }
 0x293   : > { %p1401_p6 = pneg %p1400_p10 }
 0x294   : > { %p1407_p9 = por %p1406_p8, %p1405_p5 }
 0x296   : > { %p1408_p0 = pnand %p1407_p9, %p1401_p6 }
 0x298   : > { %1411 = shalt.err (!%p1408_p0)
}
 0x299   : > { %1223 = dma.vmem_to_hbm [thread:$0]  (%p1980_p3), %s1897_s17, 128, %s1895_s11, %s1000_s13  }
 0x29a PF: > { %s1040_s29 = sand.u32 1, %s1446_s21   ;;  %p1981_p1 = scmp.ne.s32.totalorder %s1973_s10, 0 }
 0x29b   : > { %p1982_p11 = scmp.ge.s32.totalorder %s1458_s24, 2  ;;  %s1041_s25 = scalar_lea.sflag [#allocation8], %s1040_s29 }
 0x29d   : > { %p1234_p12 = pnand %p1982_p11, %p1981_p1 }
 0x29f   : > { %1437 = dma.done.wait (!%p1234_p12), %s1041_s25, 128  }
 0x2a0   : > { %1439 = vsyncadd (!%p1234_p12), %s1041_s25, 4294967168  ;;  %s1050_s15 = scalar_lea.sflag [#allocation13], %s1040_s29 }
 0x2a1   : > { %1441 = dma.done.wait (!%p1234_p12), %s1050_s15, 128  }
 0x2a2   : > { %1443 = vsyncadd (!%p1234_p12), %s1050_s15, 4294967168  ;;  %p26_p3 = scmp.ge.s32.totalorder %s1534_s27, 4   ;;  %s1983_s21 = smov %s1450_s22 }
 0x2a3   : > { %s1984_s22 = smov %s1454_s23  ;;  %s1985_s23 = smov %s1546_s30 }
 0x2a4   : > { %s1986_s24 = smov %s1534_s27  ;;  %28 = sbr.rel (!%p26_p3) target bundleno = 9 (0x9), region = 119 }
 0x2ab   :  { %1055 = vsyncpa [#allocation7], 1 }
 0x2ac   :  { %1057 = vsyncpa [#allocation7 + $0x1], 1 }
 0x2ad   :  { %1058 = vsyncpa [#allocation10], 1 }
 0x2ae   :  { %1060 = vsyncpa [#allocation10 + $0x1], 1 }
 0x2af   :  { %1061 = vsyncpa [#allocation8], 1 }
 0x2b0   :  { %1063 = vsyncpa [#allocation8 + $0x1], 1 }
 0x2b1   :  { %1064 = vsyncpa [#allocation13], 1 }
 0x2b2   :  { %1066 = vsyncpa [#allocation13 + $0x1], 1 }

</bundles_post_ra>
